<compile_context>
chip_gen: v6e
topology: v6e:2x2x1
jax: 0.10.0
libtpu: 0.0.40
codegen_flags: <defaults>
</compile_context>

<pallas_src>
import functools

import jax
import jax.numpy as jnp
from jax.experimental import pallas as pl
from jax.experimental.pallas import tpu as pltpu

SUBLANE = 8
LANE = 128
# ~2 MiB per pipeline block (see VMEM-budget note above).
_TARGET_BLOCK_BYTES = 2 * 1024 * 1024


def _choose_block(rows, T, itemsize):
    """Pick (row_block, time_block): lane-dense, ~_TARGET_BLOCK_BYTES each."""
    # Time axis: keep full T per block (lane-dense, unmasked stores).  Only
    # tile T when even an 8-row x T slab would blow the VMEM budget.
    tb = T
    if SUBLANE * T * itemsize > 4 * _TARGET_BLOCK_BYTES:
        for cand in (8192, 4096, 2048, 1024, 512, 256, 128):
            if T % cand == 0:
                tb = cand
                break
    # Row axis: multiple of 8, sized so one block is ~_TARGET_BLOCK_BYTES.
    rb = max(1, _TARGET_BLOCK_BYTES // max(tb * itemsize, 1))
    rb = min(rows, rb)
    if rb < rows:
        rb = max(SUBLANE, (rb // SUBLANE) * SUBLANE)
    return rb, tb


def _add_noise_tpu_kernel(seed_ref, nl_ref, x_ref, o_ref):
    # Fold both grid coordinates into the seed so every tile gets a
    # decorrelated stream (independent of which core executes it).
    pltpu.prng_seed(seed_ref[0], pl.program_id(0), pl.program_id(1))
    noise = pltpu.stateful_normal(x_ref.shape, jnp.float32)
    o_ref[...] = (x_ref[...].astype(jnp.float32)
                  + nl_ref[0] * noise).astype(o_ref.dtype)


def _add_noise_fallback_kernel(x_ref, n_ref, o_ref, *, noise_level):
    o_ref[...] = (x_ref[...].astype(jnp.float32)
                  + noise_level * n_ref[...].astype(jnp.float32)
                  ).astype(o_ref.dtype)


def add_noise_to_multichannel_timeseries(x, seed=0, noise_level=0.1):
    """x: (B, C, T). Returns x + noise_level * N(0, 1) noise, same shape/dtype."""
    B, C, T = x.shape
    rows = B * C
    x2d = x.reshape(rows, T)                      # leading-dim merge: no HBM copy
    itemsize = jnp.dtype(x.dtype).itemsize
    rb, tb = _choose_block(rows, T, itemsize)
    grid = (pl.cdiv(rows, rb), pl.cdiv(T, tb))
    # Same index_map works with or without scalar-prefetch trailing refs.
    block = pl.BlockSpec((rb, tb), lambda i, j, *_: (i, j))
    nbytes = rows * T * itemsize
    compiler_params = pltpu.CompilerParams(
        dimension_semantics=("parallel", "parallel"))

    if jax.default_backend() == "tpu":
        seed_arr = jnp.asarray([seed], dtype=jnp.int32)
        nl_arr = jnp.asarray([noise_level], dtype=jnp.float32)
        out2d = pl.pallas_call(
            _add_noise_tpu_kernel,
            out_shape=jax.ShapeDtypeStruct((rows, T), x.dtype),
            grid_spec=pltpu.PrefetchScalarGridSpec(
                num_scalar_prefetch=1,            # seed -> SMEM before the grid
                grid=grid,
                in_specs=[
                    pl.BlockSpec(memory_space=pltpu.MemorySpace.SMEM),  # noise_level
                    block,                                              # x tile
                ],
                out_specs=block,
            ),
            compiler_params=compiler_params,
            cost_estimate=pl.CostEstimate(
                flops=2 * rows * T,
                transcendentals=rows * T,          # on-chip normal transform
                bytes_accessed=2 * nbytes),        # read x + write out (noise on-chip)
            # NOTE: callers that donate `x` can add input_output_aliases={2: 0}
            # to write the result in place (not done here: the demo reuses x).
        )(seed_arr, nl_arr, x2d)
    else:
        # Fallback for non-TPU / interpret execution: TPU PRNG primitives have
        # no lowering here, so draw the noise outside and fuse scale + add.
        noise = jax.random.normal(jax.random.PRNGKey(seed), (rows, T),
                                  dtype=jnp.float32)
        out2d = pl.pallas_call(
            functools.partial(_add_noise_fallback_kernel,
                              noise_level=float(noise_level)),
            out_shape=jax.ShapeDtypeStruct((rows, T), x.dtype),
            grid=grid,
            in_specs=[block, block],
            out_specs=block,
            compiler_params=compiler_params,
        )(x2d, noise)

    return out2d.reshape(B, C, T)


if __name__ == "__main__":
    key = jax.random.PRNGKey(0)
    B, C, T = 2, 4, 256  # batch, channels, time steps
    x = jax.random.normal(key, (B, C, T), dtype=jnp.float32)

    out = add_noise_to_multichannel_timeseries(x, seed=0, noise_level=0.1)
    out = jax.block_until_ready(out)

    assert out.shape == x.shape
    assert out.dtype == x.dtype
    assert bool(jnp.all(jnp.isfinite(out)))
    # Noise magnitude sanity: residual std should be ~noise_level.
    resid_std = float(jnp.std(out - x))
    assert 0.01 < resid_std < 1.0, resid_std

    print("KERNEL_OK")
</pallas_src>

<mosaic_0001>
module attributes {stable_mosaic.version = 11 : i64} {
  func.func @_add_noise_fallback_kernel(%arg0: i32, %arg1: i32, %arg2: memref<8x256xf32, #tpu.memory_space<vmem>>, %arg3: memref<8x256xf32, #tpu.memory_space<vmem>>, %arg4: memref<8x256xf32, #tpu.memory_space<vmem>>) attributes {dimension_semantics = [#tpu.dimension_semantics<parallel>, #tpu.dimension_semantics<parallel>], iteration_bounds = array<i64: 1, 1>, scalar_prefetch = 0 : i64, scratch_operands = 0 : i64, tpu.core_type = #tpu.core_type<tc>, window_params = [{transform_indices = @transform_0, window_bounds = array<i64: 8, 256>}, {transform_indices = @transform_1, window_bounds = array<i64: 8, 256>}, {transform_indices = @transform_2, window_bounds = array<i64: 8, 256>}]} {
    %c0 = arith.constant 0 : index
    %c0_0 = arith.constant 0 : index
    %0 = vector.load %arg2[%c0, %c0_0] : memref<8x256xf32, #tpu.memory_space<vmem>>, vector<8x256xf32>
    %c0_1 = arith.constant 0 : index
    %c0_2 = arith.constant 0 : index
    %1 = vector.load %arg3[%c0_1, %c0_2] : memref<8x256xf32, #tpu.memory_space<vmem>>, vector<8x256xf32>
    %cst = arith.constant 1.000000e-01 : f32
    %2 = vector.broadcast %cst : f32 to vector<8x256xf32>
    %3 = arith.mulf %2, %1 : vector<8x256xf32>
    %4 = arith.addf %0, %3 : vector<8x256xf32>
    %c0_3 = arith.constant 0 : index
    %c0_4 = arith.constant 0 : index
    %5 = vector.load %arg4[%c0_3, %c0_4] : memref<8x256xf32, #tpu.memory_space<vmem>>, vector<8x256xf32>
    tpu.vector_store %arg4[%c0_3, %c0_4], %4 {strides = array<i32>} : memref<8x256xf32, #tpu.memory_space<vmem>>, vector<8x256xf32>,
    return
  }
  func.func @transform_0(%arg0: i32, %arg1: i32) -> (i32, i32) {
    %c0_i32 = arith.constant 0 : i32
    return %arg0, %arg1 : i32, i32
  }
  func.func @transform_1(%arg0: i32, %arg1: i32) -> (i32, i32) {
    %c0_i32 = arith.constant 0 : i32
    return %arg0, %arg1 : i32, i32
  }
  func.func @transform_2(%arg0: i32, %arg1: i32) -> (i32, i32) {
    %c0_i32 = arith.constant 0 : i32
    return %arg0, %arg1 : i32, i32
  }
}

</mosaic_0001>

<bundles_post_ra>
// kernel: tpu_custom_call.1
= control target key start
LH: loop header
LB: loop body
LE: loop exit
PB: predicated region body
PF: predicated region fallthrough
CT: control target
= control target key end

     0   :  { %7 = vsyncpa [#allocation3], 0  ;;  %s158_s0 = inlined_call_operand.hbm [shape: f32[8,256], index: 0, kind: input, shape index: {}]   ;;  %s159_s1 = inlined_call_operand.hbm [shape: f32[8,256], index: 1, kind: input, shape index: {}]   ;;  %s160_s2 = inlined_call_operand.hbm [shape: f32[8,256], index: 2, kind: output, shape index: {}]  }
   0x1   :  { %8 = vsyncpa [#allocation6], 0 }
   0x2   :  { %9 = vsyncpa [#allocation4], 0  ;;  %s131_s9 = smov [#allocation2]   ;;  %s132_s11 = smov [#allocation5]  }
   0x3   :  { %s16_s10 = sshll.u32 %s131_s9, 4  ;;  %s26_s12 = sshll.u32 %s132_s11, 4  ;;  %s17_s10 = int_to_ptr.vmem [resolvable:$true] %s16_s10  ;;  %s27_s12 = int_to_ptr.vmem [resolvable:$true] %s26_s12 }
   0x4   :  { %s73_s13 = scalar_lea.vmem %s17_s10, 256  ;;  %p78_p1 = scmp.lt.s32.totalorder %s17_s10, %s17_s10 }
   0x5   :  { %p74_p0 = scmp.ne.s32.totalorder %s17_s10, %s73_s13  ;;  %p79_p2 = scmp.lt.s32.totalorder %s73_s13, %s73_s13 }
   0x7   :  { %p80_p3 = por %p79_p2, %p78_p1 }
   0x9   :  { %p81_p4 = pnand %p80_p3, %p74_p0 }
   0xb   :  { %84 = shalt.err (!%p81_p4)
}
   0xc   :  { %19 = dma.hbm_to_vmem [thread:$0]  %s158_s0, 256, %s17_s10, [#allocation3]  }
   0xd   :  { %s93_s16 = scalar_lea.vmem %s27_s12, 256  ;;  %p98_p6 = scmp.lt.s32.totalorder %s27_s12, %s27_s12 }
   0xe   :  { %p94_p5 = scmp.ne.s32.totalorder %s27_s12, %s93_s16  ;;  %p99_p7 = scmp.lt.s32.totalorder %s93_s16, %s93_s16 }
  0x10   :  { %p100_p8 = por %p99_p7, %p98_p6 }
  0x12   :  { %p101_p9 = pnand %p100_p8, %p94_p5 }
  0x14   :  { %104 = shalt.err (!%p101_p9)
}
  0x15   :  { %29 = dma.hbm_to_vmem [thread:$0]  %s159_s1, 256, %s27_s12, [#allocation6]  }
  0x16   :  { %125 = dma.done.wait [#allocation3], 256  }
  0x17   :  { %126 = vsyncadd [#allocation3], 4294967040 }
  0x18   :  { %127 = dma.done.wait [#allocation6], 256  }
  0x19   :  { %128 = vsyncadd [#allocation6], 4294967040  ;;  %v36_v0 = vld [vmem:[#allocation2] sm:$0xff]  ;;  %v38_v1 = vld [vmem:[#allocation5] sm:$0xff]  ;;  %s133_s0 = smov [#allocation7]  }
  0x1a   :  { %v40_v2 = vmul.f32 0.1, %v38_v1  ;;  %v37_v3 = vld [vmem:[#allocation2 + $0x8] sm:$0xff]  ;;  %v39_v4 = vld [vmem:[#allocation5 + $0x8] sm:$0xff]  ;;  %s52_s19 = sshll.u32 %s133_s0, 4  ;;  %s53_s19 = int_to_ptr.vmem [resolvable:$true] %s52_s19 }
  0x1b   :  { %v41_v5 = vmul.f32 0.1, %v39_v4  ;;  %s105_s20 = scalar_lea.vmem %s53_s19, 256  ;;  %p110_p11 = scmp.lt.s32.totalorder %s53_s19, %s53_s19 }
  0x1c   :  { %v42_v6 = vadd.f32 %v40_v2, %v36_v0  ;;  %p106_p10 = scmp.ne.s32.totalorder %s53_s19, %s105_s20  ;;  %p111_p12 = scmp.lt.s32.totalorder %s105_s20, %s105_s20 }
  0x1d   :  { %v43_v7 = vadd.f32 %v41_v5, %v37_v3 }
  0x1e   :  { %44 = vst [vmem:[#allocation7] sm:$0xff] %v42_v6  ;;  %p112_p13 = por %p111_p12, %p110_p11 }
  0x1f   :  { %45 = vst [vmem:[#allocation7 + $0x8] sm:$0xff] %v43_v7 }
  0x20   :  { %p113_p0 = pnand %p112_p13, %p106_p10 }
  0x22   :  { %116 = shalt.err (!%p113_p0)
}
  0x23   :  { %55 = dma.vmem_to_hbm [thread:$0]  %s53_s19, 256, %s160_s2, [#allocation4]  }
  0x24   :  { %129 = dma.done.wait [#allocation4], 256  }
  0x25   :  { %130 = vsyncadd [#allocation4], 4294967040 }
  0x26   :  { %59 = vsyncpa [#allocation3], 1 }
  0x27   :  { %60 = vsyncpa [#allocation6], 1 }
  0x28   :  { %61 = vsyncpa [#allocation4], 1 }

</bundles_post_ra>
